<compile_context>
chip_gen: v6e
topology: v6e:2x2x1
jax: 0.10.0
libtpu: 0.0.40
codegen_flags: <defaults>
</compile_context>

<pallas_src>
import jax
import jax.numpy as jnp
from jax.experimental import pallas as pl
from jax.experimental.pallas import tpu as pltpu


def autoencoder_kernel(x_ref,
                       w1_ref, b1_ref,
                       w2_ref, b2_ref,
                       w3_ref, b3_ref,
                       w4_ref, b4_ref,
                       o_ref):
    x = x_ref[...]

    # encoder
    h = jnp.dot(x, w1_ref[...], preferred_element_type=jnp.float32) + b1_ref[...]
    h = jnp.maximum(h, 0.0)
    z = jnp.dot(h, w2_ref[...], preferred_element_type=jnp.float32) + b2_ref[...]

    # decoder
    h = jnp.dot(z, w3_ref[...], preferred_element_type=jnp.float32) + b3_ref[...]
    h = jnp.maximum(h, 0.0)
    y = jnp.dot(h, w4_ref[...], preferred_element_type=jnp.float32) + b4_ref[...]

    o_ref[...] = y.astype(o_ref.dtype)


def autoencoder_forward(x, params, *, block_batch=1024):
    (w1, b1), (w2, b2), (w3, b3), (w4, b4) = params
    batch, input_dim = x.shape

    # Batch tile: largest useful block (double-buffered x and out tiles stay
    # far under VMEM limits for narrow feature dims). Must be a multiple of 8
    # (sublane) unless it equals the full batch.
    tb = min(block_batch, batch)
    if tb != batch:
        tb = max(8, (tb // 8) * 8)
    grid = (pl.cdiv(batch, tb),)

    # x / out are tiled along batch and pipelined.
    x_spec = pl.BlockSpec((tb, input_dim), lambda i: (i, 0))
    out_spec = pl.BlockSpec((tb, input_dim), lambda i: (i, 0))

    # Weights/biases: full-array blocks with a constant index_map -> fetched
    # once, held in VMEM for the whole grid.
    def const(arr):
        return pl.BlockSpec(arr.shape, lambda i: (0,) * arr.ndim)

    # Advisory cost estimate (memory-bound: ~2*(32*D+256) FLOPs per row).
    h1, h2 = w1.shape[1], w2.shape[1]
    flops = 2 * batch * (input_dim * h1 + h1 * h2 + h2 * h1 + h1 * input_dim)
    bytes_accessed = (
        2 * batch * input_dim * x.dtype.itemsize
        + sum(a.size * a.dtype.itemsize
              for a in (w1, b1, w2, b2, w3, b3, w4, b4)))

    return pl.pallas_call(
        autoencoder_kernel,
        out_shape=jax.ShapeDtypeStruct((batch, input_dim), x.dtype),
        grid=grid,
        in_specs=[
            x_spec,
            const(w1), const(b1),
            const(w2), const(b2),
            const(w3), const(b3),
            const(w4), const(b4),
        ],
        out_specs=out_spec,
        compiler_params=pltpu.CompilerParams(
            dimension_semantics=("parallel",)),   # megacore shard on v7x
        cost_estimate=pl.CostEstimate(
            flops=flops, transcendentals=0, bytes_accessed=bytes_accessed),
    )(x, w1, b1, w2, b2, w3, b3, w4, b4)


def init_linear(key, in_features, out_features):
    # Deterministic init mimicking PyTorch's default: U(-1/sqrt(in), 1/sqrt(in)).
    kw, kb = jax.random.split(key)
    bound = 1.0 / jnp.sqrt(jnp.float32(in_features))
    # Stored as (in, out) so forward is x @ W + b.
    w = jax.random.uniform(kw, (in_features, out_features), jnp.float32,
                           minval=-bound, maxval=bound)
    b = jax.random.uniform(kb, (1, out_features), jnp.float32,
                           minval=-bound, maxval=bound)
    return w, b


def reference_forward(x, params):
    (w1, b1), (w2, b2), (w3, b3), (w4, b4) = params
    h = jnp.maximum(x @ w1 + b1, 0.0)
    z = h @ w2 + b2
    h = jnp.maximum(z @ w3 + b3, 0.0)
    return h @ w4 + b4


if __name__ == "__main__":
    key = jax.random.PRNGKey(0)
    k_x, k1, k2, k3, k4 = jax.random.split(key, 5)

    batch = 64
    input_dim = 32

    x = jax.random.normal(k_x, (batch, input_dim), jnp.float32)

    params = (
        init_linear(k1, input_dim, 16),   # encoder.0
        init_linear(k2, 16, 8),           # encoder.2
        init_linear(k3, 8, 16),           # decoder.0
        init_linear(k4, 16, input_dim),   # decoder.2
    )

    # Small block_batch here so the demo actually exercises a multi-step,
    # pipelined batch grid (64 rows / 16-row tiles -> 4 grid steps). For real
    # workloads leave the default (1024+) so per-step overhead amortizes.
    out = autoencoder_forward(x, params, block_batch=16)
    out = jax.block_until_ready(out)

    ref = reference_forward(x, params)
    assert out.shape == (batch, input_dim)
    assert jnp.allclose(out, ref, atol=1e-5, rtol=1e-5), "mismatch vs reference"

    print("KERNEL_OK")
</pallas_src>

<mosaic_0001>
module attributes {stable_mosaic.version = 11 : i64} {
  func.func @autoencoder_kernel(%arg0: i32, %arg1: memref<16x32xf32, #tpu.memory_space<vmem>>, %arg2: memref<32x16xf32, #tpu.memory_space<vmem>>, %arg3: memref<1x16xf32, #tpu.memory_space<vmem>>, %arg4: memref<16x8xf32, #tpu.memory_space<vmem>>, %arg5: memref<1x8xf32, #tpu.memory_space<vmem>>, %arg6: memref<8x16xf32, #tpu.memory_space<vmem>>, %arg7: memref<1x16xf32, #tpu.memory_space<vmem>>, %arg8: memref<16x32xf32, #tpu.memory_space<vmem>>, %arg9: memref<1x32xf32, #tpu.memory_space<vmem>>, %arg10: memref<16x32xf32, #tpu.memory_space<vmem>>) attributes {dimension_semantics = [#tpu.dimension_semantics<parallel>], iteration_bounds = array<i64: 4>, scalar_prefetch = 0 : i64, scratch_operands = 0 : i64, tpu.core_type = #tpu.core_type<tc>, window_params = [{transform_indices = @transform_0, window_bounds = array<i64: 16, 32>}, {pipeline_mode = #tpu.pipeline_mode<synchronous>, transform_indices = @transform_1, window_bounds = array<i64: 32, 16>}, {pipeline_mode = #tpu.pipeline_mode<synchronous>, transform_indices = @transform_2, window_bounds = array<i64: 1, 16>}, {pipeline_mode = #tpu.pipeline_mode<synchronous>, transform_indices = @transform_3, window_bounds = array<i64: 16, 8>}, {pipeline_mode = #tpu.pipeline_mode<synchronous>, transform_indices = @transform_4, window_bounds = array<i64: 1, 8>}, {pipeline_mode = #tpu.pipeline_mode<synchronous>, transform_indices = @transform_5, window_bounds = array<i64: 8, 16>}, {pipeline_mode = #tpu.pipeline_mode<synchronous>, transform_indices = @transform_6, window_bounds = array<i64: 1, 16>}, {pipeline_mode = #tpu.pipeline_mode<synchronous>, transform_indices = @transform_7, window_bounds = array<i64: 16, 32>}, {pipeline_mode = #tpu.pipeline_mode<synchronous>, transform_indices = @transform_8, window_bounds = array<i64: 1, 32>}, {transform_indices = @transform_9, window_bounds = array<i64: 16, 32>}]} {
    %c0 = arith.constant 0 : index
    %c0_0 = arith.constant 0 : index
    %0 = vector.load %arg1[%c0, %c0_0] : memref<16x32xf32, #tpu.memory_space<vmem>>, vector<16x32xf32>
    %c0_1 = arith.constant 0 : index
    %c0_2 = arith.constant 0 : index
    %1 = vector.load %arg2[%c0_1, %c0_2] : memref<32x16xf32, #tpu.memory_space<vmem>>, vector<32x16xf32>
    %cst = arith.constant dense<0.000000e+00> : vector<16x16xf32>
    %2 = tpu.matmul %0, %1, %cst {dimension_numbers = #tpu.dot_dimension_numbers<[1], [0], [0], [1], [0, 0, 1, 1], [], []>} : vector<16x32xf32>, vector<32x16xf32>, vector<16x16xf32> -> vector<16x16xf32>
    %c0_3 = arith.constant 0 : index
    %c0_4 = arith.constant 0 : index
    %3 = vector.load %arg3[%c0_3, %c0_4] : memref<1x16xf32, #tpu.memory_space<vmem>>, vector<1x16xf32>
    %4 = vector.broadcast %3 : vector<1x16xf32> to vector<16x16xf32>
    %5 = arith.addf %2, %4 : vector<16x16xf32>
    %cst_5 = arith.constant 0.000000e+00 : f32
    %6 = vector.broadcast %cst_5 : f32 to vector<16x16xf32>
    %7 = arith.maximumf %5, %6 : vector<16x16xf32>
    %c0_6 = arith.constant 0 : index
    %c0_7 = arith.constant 0 : index
    %8 = vector.load %arg4[%c0_6, %c0_7] : memref<16x8xf32, #tpu.memory_space<vmem>>, vector<16x8xf32>
    %cst_8 = arith.constant dense<0.000000e+00> : vector<16x8xf32>
    %9 = tpu.matmul %7, %8, %cst_8 {dimension_numbers = #tpu.dot_dimension_numbers<[1], [0], [0], [1], [0, 0, 1, 1], [], []>} : vector<16x16xf32>, vector<16x8xf32>, vector<16x8xf32> -> vector<16x8xf32>
    %c0_9 = arith.constant 0 : index
    %c0_10 = arith.constant 0 : index
    %10 = vector.load %arg5[%c0_9, %c0_10] : memref<1x8xf32, #tpu.memory_space<vmem>>, vector<1x8xf32>
    %11 = vector.broadcast %10 : vector<1x8xf32> to vector<16x8xf32>
    %12 = arith.addf %9, %11 : vector<16x8xf32>
    %c0_11 = arith.constant 0 : index
    %c0_12 = arith.constant 0 : index
    %13 = vector.load %arg6[%c0_11, %c0_12] : memref<8x16xf32, #tpu.memory_space<vmem>>, vector<8x16xf32>
    %cst_13 = arith.constant dense<0.000000e+00> : vector<16x16xf32>
    %14 = tpu.matmul %12, %13, %cst_13 {dimension_numbers = #tpu.dot_dimension_numbers<[1], [0], [0], [1], [0, 0, 1, 1], [], []>} : vector<16x8xf32>, vector<8x16xf32>, vector<16x16xf32> -> vector<16x16xf32>
    %c0_14 = arith.constant 0 : index
    %c0_15 = arith.constant 0 : index
    %15 = vector.load %arg7[%c0_14, %c0_15] : memref<1x16xf32, #tpu.memory_space<vmem>>, vector<1x16xf32>
    %16 = vector.broadcast %15 : vector<1x16xf32> to vector<16x16xf32>
    %17 = arith.addf %14, %16 : vector<16x16xf32>
    %cst_16 = arith.constant 0.000000e+00 : f32
    %18 = vector.broadcast %cst_16 : f32 to vector<16x16xf32>
    %19 = arith.maximumf %17, %18 : vector<16x16xf32>
    %c0_17 = arith.constant 0 : index
    %c0_18 = arith.constant 0 : index
    %20 = vector.load %arg8[%c0_17, %c0_18] : memref<16x32xf32, #tpu.memory_space<vmem>>, vector<16x32xf32>
    %cst_19 = arith.constant dense<0.000000e+00> : vector<16x32xf32>
    %21 = tpu.matmul %19, %20, %cst_19 {dimension_numbers = #tpu.dot_dimension_numbers<[1], [0], [0], [1], [0, 0, 1, 1], [], []>} : vector<16x16xf32>, vector<16x32xf32>, vector<16x32xf32> -> vector<16x32xf32>
    %c0_20 = arith.constant 0 : index
    %c0_21 = arith.constant 0 : index
    %22 = vector.load %arg9[%c0_20, %c0_21] : memref<1x32xf32, #tpu.memory_space<vmem>>, vector<1x32xf32>
    %23 = vector.broadcast %22 : vector<1x32xf32> to vector<16x32xf32>
    %24 = arith.addf %21, %23 : vector<16x32xf32>
    %c0_22 = arith.constant 0 : index
    %c0_23 = arith.constant 0 : index
    %25 = vector.load %arg10[%c0_22, %c0_23] : memref<16x32xf32, #tpu.memory_space<vmem>>, vector<16x32xf32>
    tpu.vector_store %arg10[%c0_22, %c0_23], %24 {strides = array<i32>} : memref<16x32xf32, #tpu.memory_space<vmem>>, vector<16x32xf32>,
    return
  }
  func.func @transform_0(%arg0: i32) -> (i32, i32) {
    %c0_i32 = arith.constant 0 : i32
    %c0_i32_0 = arith.constant 0 : i32
    return %arg0, %c0_i32 : i32, i32
  }
  func.func @transform_1(%arg0: i32) -> (i32, i32) {
    %c0_i32 = arith.constant 0 : i32
    %c0_i32_0 = arith.constant 0 : i32
    %c0_i32_1 = arith.constant 0 : i32
    return %c0_i32, %c0_i32_0 : i32, i32
  }
  func.func @transform_2(%arg0: i32) -> (i32, i32) {
    %c0_i32 = arith.constant 0 : i32
    %c0_i32_0 = arith.constant 0 : i32
    %c0_i32_1 = arith.constant 0 : i32
    return %c0_i32, %c0_i32_0 : i32, i32
  }
  func.func @transform_3(%arg0: i32) -> (i32, i32) {
    %c0_i32 = arith.constant 0 : i32
    %c0_i32_0 = arith.constant 0 : i32
    %c0_i32_1 = arith.constant 0 : i32
    return %c0_i32, %c0_i32_0 : i32, i32
  }
  func.func @transform_4(%arg0: i32) -> (i32, i32) {
    %c0_i32 = arith.constant 0 : i32
    %c0_i32_0 = arith.constant 0 : i32
    %c0_i32_1 = arith.constant 0 : i32
    return %c0_i32, %c0_i32_0 : i32, i32
  }
  func.func @transform_5(%arg0: i32) -> (i32, i32) {
    %c0_i32 = arith.constant 0 : i32
    %c0_i32_0 = arith.constant 0 : i32
    %c0_i32_1 = arith.constant 0 : i32
    return %c0_i32, %c0_i32_0 : i32, i32
  }
  func.func @transform_6(%arg0: i32) -> (i32, i32) {
    %c0_i32 = arith.constant 0 : i32
    %c0_i32_0 = arith.constant 0 : i32
    %c0_i32_1 = arith.constant 0 : i32
    return %c0_i32, %c0_i32_0 : i32, i32
  }
  func.func @transform_7(%arg0: i32) -> (i32, i32) {
    %c0_i32 = arith.constant 0 : i32
    %c0_i32_0 = arith.constant 0 : i32
    %c0_i32_1 = arith.constant 0 : i32
    return %c0_i32, %c0_i32_0 : i32, i32
  }
  func.func @transform_8(%arg0: i32) -> (i32, i32) {
    %c0_i32 = arith.constant 0 : i32
    %c0_i32_0 = arith.constant 0 : i32
    %c0_i32_1 = arith.constant 0 : i32
    return %c0_i32, %c0_i32_0 : i32, i32
  }
  func.func @transform_9(%arg0: i32) -> (i32, i32) {
    %c0_i32 = arith.constant 0 : i32
    %c0_i32_0 = arith.constant 0 : i32
    return %arg0, %c0_i32 : i32, i32
  }
}

</mosaic_0001>

<bundles_post_ra>
// kernel: tpu_custom_call.1
= control target key start
LH: loop header
LB: loop body
LE: loop exit
PB: predicated region body
PF: predicated region fallthrough
CT: control target
= control target key end

     0   :  { %s900_s30 = smov 0   ;;  %s971_s0 = inlined_call_operand.vmem [shape: f32[64,32], index: 0, kind: input, shape index: {}]   ;;  %s972_s1 = inlined_call_operand.vmem [shape: f32[32,16], index: 1, kind: input, shape index: {}]   ;;  %s973_s2 = inlined_call_operand.vmem [shape: f32[1,16], index: 2, kind: input, shape index: {}]   ;;  %s974_s3 = inlined_call_operand.vmem [shape: f32[16,8], index: 3, kind: input, shape index: {}]   ;;  %s975_s4 = inlined_call_operand.vmem [shape: f32[1,8], index: 4, kind: input, shape index: {}]   ;;  %s976_s5 = inlined_call_operand.vmem [shape: f32[8,16], index: 5, kind: input, shape index: {}]   ;;  %s977_s6 = inlined_call_operand.vmem [shape: f32[1,16], index: 6, kind: input, shape index: {}]   ;;  %s978_s7 = inlined_call_operand.vmem [shape: f32[16,32], index: 7, kind: input, shape index: {}]   ;;  %s979_s8 = inlined_call_operand.vmem [shape: f32[1,32], index: 8, kind: input, shape index: {}]   ;;  %s980_s9 = inlined_call_operand.vmem [shape: f32[64,32], index: 9, kind: output, shape index: {}]  }
   0x1 LB: > { %s764_s10 = sadd.s32 4294967295, %s848_s30   ;;  %p768_p0 = scmp.ge.s32.totalorder %s848_s30, 1  ;;  %s848_s30 = sphi %s900_s30, %s19_s30  }
   0x2   : > { %p288_p1 = scmp.lt.s32.totalorder %s848_s30, 5 }
   0x4   : > { %p289_p2 = pnand %p768_p0, %p288_p1 }
   0x5   : > { %s769_s15 = sshll.u32 (!%p289_p2), %s764_s10, 1 }
   0x6   : > { %292 = sbr.rel (%p289_p2) target bundleno = 816 (0x330), region = 56  ;;  %p325_p3 = scmp.lt.s32.totalorder (!%p289_p2), %s769_s15, 7 }
   0xb   : > { %v341_v0 = vld [vmem:[%s972_s1 + $0x18] sm:$0xff]  ;;  %v340_v1 = vld [vmem:[%s972_s1 + $0x10] sm:$0xff]  ;;  %v339_v2 = vld [vmem:[%s972_s1 + $0x8] sm:$0xff]  ;;  %s982_s15 = smov (!%p325_p3, %s769_s15), 7  ;;  %vm349_vm0 = vcmask 261120   ;;  %vm442_vm1 = vcmask 130048  }
   0xc   : > { %804 = vmatprep.subr.mxu0 %v341_v0  ;;  %v338_v3 = vld [vmem:[%s972_s1] sm:$0xff]  ;;  %s770_s20 = sshll.u32 %s982_s15, 3  ;;  %v434_v6 = vld [vmem:[%s974_s3 + $0x8] sm:$0xff]  ;;  %vm532_vm2 = vcmask 64512  }
   0xd   : > { %805 = vmatpush3.msra.mxu0 %v341_v0  ;;  %s328_s23 = scalar_lea.vmem %s971_s0, %s770_s20  ;;  %815 = vmatprep.subr.mxu1 %v434_v6  ;;  %v433_v7 = vld [vmem:[%s974_s3] sm:$0xff]  ;;  %v617_v21 = vld [vmem:[%s978_s7 + $0x8] sm:$0xff]  ;;  %s334_s26 = scalar_lea.vmem %s980_s9, %s770_s20 }
   0xe   : > { %806 = vmatprep.subr.mxu0 %v340_v1  ;;  %v336_v4 = vld [vmem:[%s328_s23] sm:$0xff]  ;;  %v337_v5 = vld [vmem:[%s328_s23 + $0x8] sm:$0xff]  ;;  %816 = vmatpush3.msra.mxu1 %v434_v6 }
   0xf   : > { %807 = vmatpush3.msra.mxu0 %v340_v1  ;;  %812 = vmatprep.mubr.msk.f32.mxu0 %vm349_vm0, %v336_v4  ;;  %v773_v8 = vld [vmem:[%s973_s2] ss:$0 sm:$0xff] }
  0x10   : > { %808 = vmatprep.subr.mxu0 %v339_v2  ;;  %817 = vmatprep.subr.mxu1 %v433_v7  ;;  %v524_v15 = vld [vmem:[%s976_s5] sm:$0xff] }
  0x11   : > { %809 = vmatpush3.msra.mxu0 %v339_v2  ;;  %818 = vmatpush3.msra.mxu1 %v433_v7  ;;  %v776_v17 = vld [vmem:[%s975_s4] ss:$0 sm:$0xff] }
  0x12   : > { %810 = vmatprep.subr.mxu0 %v338_v3  ;;  %822 = vmatprep.subr.mxu1 %v524_v15  ;;  %v616_v22 = vld [vmem:[%s978_s7] sm:$0xff] }
  0x13   : > { %811 = vmatpush3.msra.mxu0 %v338_v3  ;;  %v779_v23 = vld [vmem:[%s977_s6] ss:$0 sm:$0xff] }
  0x14   : > { %813 = vmatmul.mubr.msk.f32.vlgmr.msra.gmra.mxu0 %vm349_vm0, %v337_v5  ;;  %827 = vmatprep.subr.mxu0 %v617_v21  ;;  %v782_v31 = vld [vmem:[%s979_s8] ss:$0 sm:$0xff] }
  0x15   : > { %828 = vmatpush3.msra.mxu0 %v617_v21 }
  0x16   : > { %829 = vmatprep.subr.mxu0 %v616_v22 }
  0x17   : > { %830 = vmatpush3.msra.mxu0 %v616_v22 }
  0xd4   : > { %v814_v9 = vpop.f32.mrf.mxu0 }
  0xd5   : > { %v428_v10 = vadd.f32 %v814_v9, %v773_v8 }
  0xd6   : > { %v422_v11 = vpop.f32.mrf.mxu0 }
  0xd7   : > { %v423_v12 = vadd.f32 %v773_v8, %v422_v11  ;;  %v432_v14 = vmax.f32 %v428_v10, 0.0 }
  0xd9   : > { %v431_v13 = vmax.f32 %v423_v12, 0.0 }
  0xdb   : > { %819 = vmatprep.mubr.msk.f32.mxu1 %vm442_vm1, %v431_v13 }
  0xdc   : > { %820 = vmatmul.mubr.msk.f32.vlgmr.msra.gmra.mxu1 %vm442_vm1, %v432_v14 }
  0xdd   : > { %823 = vmatpush3.msra.mxu1 %v524_v15 }
 0x19c   : > { %v821_v16 = vpop.f32.mrf.mxu1 }
 0x19d   : > { %v521_v20 = vadd.f32 %v821_v16, %v776_v17 }
 0x19e   : > { %v515_v18 = vpop.f32.mrf.mxu1 }
 0x19f   : > { %v516_v19 = vadd.f32 %v776_v17, %v515_v18 }
 0x1a1   : > { %824 = vmatprep.mubr.msk.f32.mxu1 %vm532_vm2, %v516_v19 }
 0x1a2   : > { %825 = vmatmul.mubr.msk.f32.vlgmr.msra.gmra.mxu1 %vm532_vm2, %v521_v20 }
 0x262   : > { %v826_v24 = vpop.f32.mrf.mxu1 }
 0x263   : > { %v611_v25 = vadd.f32 %v826_v24, %v779_v23 }
 0x264   : > { %v605_v26 = vpop.f32.mrf.mxu1 }
 0x265   : > { %v606_v27 = vadd.f32 %v779_v23, %v605_v26  ;;  %v615_v29 = vmax.f32 %v611_v25, 0.0 }
 0x267   : > { %v614_v28 = vmax.f32 %v606_v27, 0.0 }
 0x269   : > { %831 = vmatprep.mubr.msk.f32.mxu0 %vm442_vm1, %v614_v28 }
 0x26a   : > { %832 = vmatmul.mubr.msk.f32.vlgmr.msra.gmra.mxu0 %vm442_vm1, %v615_v29 }
 0x32a   : > { %v833_v30 = vpop.f32.mrf.mxu0 }
 0x32b   : > { %v703_v34 = vadd.f32 %v833_v30, %v782_v31 }
 0x32c   : > { %v697_v32 = vpop.f32.mrf.mxu0 }
 0x32d   : > { %v698_v33 = vadd.f32 %v782_v31, %v697_v32  ;;  %707 = vst.msk [vmem:[%s334_s26 + $0x8] sm:$0xff] %vm349_vm0, %v703_v34 }
 0x32f   : > { %706 = vst.msk [vmem:[%s334_s26] sm:$0xff] %vm349_vm0, %v698_v33 }
 0x330 PF: > { %s19_s30 = sadd.s32 1, %s848_s30  }
 0x331   : > { %p16_p4 = scmp.ge.s32.totalorder %s19_s30, 6  }
 0x333   :  { %18 = sbr.rel (!%p16_p4) target bundleno = 1 (0x1), region = 86 }

</bundles_post_ra>
